<compile_context>
chip_gen: v7x
topology: tpu7x:2x2x1
jax: 0.10.0
libtpu: 0.0.40
codegen_flags: <defaults>
</compile_context>

<pallas_src>
import functools
import math

import jax
import jax.numpy as jnp
from jax.experimental import pallas as pl
from jax.experimental.pallas import tpu as pltpu


def _gate_kernel(x_ref, wt_ref, *rest, topk: int, score_func: str,
                 route_scale: float, has_bias: bool):
    # x_ref:   (block_rows, dim)
    # wt_ref:  (dim, n_experts)     -- grid-invariant, resident in VMEM
    # b_ref:   (1, n_experts) f32   -- only present when has_bias
    # wout_ref:(block_rows, topk)   routing weights (x dtype)
    # iout_ref:(block_rows, topk)   expert indices (int32)
    if has_bias:
        b_ref, wout_ref, iout_ref = rest
    else:
        wout_ref, iout_ref = rest

    x = x_ref[...]
    wt = wt_ref[...]

    # Router logits, accumulated in f32 on the MXU.
    scores = jnp.dot(x, wt, preferred_element_type=jnp.float32)
    if has_bias:
        scores = scores + b_ref[...]

    if score_func == "softmax":
        # Deferred softmax: top-k ordering is invariant under the positive
        # normalization, so select on e = exp(scores - m) and divide only the
        # k winners at the end (EUP reciprocal, ~free slot).
        m = jnp.max(scores, axis=-1, keepdims=True)
        s = jnp.exp(scores - m)                           # (rows, E), in (0, 1]
        denom = jnp.sum(s, axis=-1, keepdims=True)
    else:  # "sigmoid"
        s = jax.nn.sigmoid(scores)                        # (0, 1)
        denom = None

    n_experts = s.shape[-1]
    picked_vals, picked_ids = [], []

    index_bits = max(1, (n_experts - 1).bit_length())
    if index_bits <= 8:
        # Fused value+argmax: s >= 0, so f32 ordering == bit-pattern ordering.
        # Clear the low `index_bits` mantissa bits and OR in the reversed expert
        # id; a single max-reduce per step yields both the (slightly truncated)
        # max value and the lowest-index argmax.
        low_mask = (1 << index_bits) - 1
        rev_ids = (n_experts - 1) - jax.lax.broadcasted_iota(jnp.int32, s.shape, 1)
        s_bits = pltpu.bitcast(s, jnp.int32)
        packed = pltpu.bitcast((s_bits & ~low_mask) | rev_ids, jnp.float32)
        for _ in range(topk):
            pmax = jnp.max(packed, axis=-1, keepdims=True)      # one XLU reduce
            bits = pltpu.bitcast(pmax, jnp.int32)
            rid = bits & low_mask                                # reversed id
            picked_ids.append((n_experts - 1) - rid)
            picked_vals.append(pltpu.bitcast(bits & ~low_mask, jnp.float32))
            packed = jnp.where(rev_ids == rid, jnp.float32(-1.0), packed)
    else:
        # Fallback for very large expert counts: separate value / argmax reductions.
        expert_ids = jax.lax.broadcasted_iota(jnp.int32, s.shape, 1)
        ids_f = expert_ids.astype(jnp.float32)
        for _ in range(topk):
            vmax = jnp.max(s, axis=-1, keepdims=True)
            idx = jnp.min(jnp.where(s == vmax, ids_f, jnp.float32(n_experts)),
                          axis=-1, keepdims=True).astype(jnp.int32)
            picked_vals.append(vmax)
            picked_ids.append(idx)
            s = jnp.where(expert_ids == idx, jnp.float32(-1.0), s)

    # One lane-dense store per output instead of `topk` masked width-1 stores.
    w = jnp.concatenate(picked_vals, axis=-1)              # (rows, topk) f32
    idxs = jnp.concatenate(picked_ids, axis=-1)            # (rows, topk) int32

    if score_func == "softmax":
        inv = pl.reciprocal(denom, approx=True)            # EUP slot
    else:
        inv = pl.reciprocal(jnp.sum(w, axis=-1, keepdims=True), approx=True)
    wout_ref[...] = (w * (inv * jnp.float32(route_scale))).astype(wout_ref.dtype)
    iout_ref[...] = idxs


def _vmem_capacity_bytes() -> int:
    try:
        return int(pltpu.get_tpu_info().vmem_capacity_bytes)
    except Exception:
        return 64 << 20        # conservative: v7x per-TC VMEM


def _pick_block_rows(rows: int, dim: int, n_experts: int, itemsize: int,
                     vmem_capacity: int) -> int:
    """Generation-aware row tile, sublane-pack aligned, >= 2 grid steps."""
    sublane = {4: 8, 2: 16, 1: 32}.get(itemsize, 8)
    # Per-row VMEM footprint: 2x double-buffered x row + ~6 live (n_experts,)
    # f32 intermediates (scores, e, packed, iota, masks).
    per_row = 2 * dim * itemsize + 6 * n_experts * 4
    # Bigger streaming tiles on 128 MiB VMEM parts (v5e/v6e), tighter on v7x.
    budget = (32 << 20) if vmem_capacity >= (100 << 20) else (16 << 20)
    br = max(sublane, (budget // per_row) // sublane * sublane)
    if br >= rows:
        # Guarantee >= 2 grid steps so ("parallel",) splits rows across the two
        # TensorCores on v7x; harmless on single-TC v5e/v6e.
        half = -(-rows // 2)
        half = ((half + sublane - 1) // sublane) * sublane
        br = half if half < rows else rows
    return br


def gate(x: jax.Array, weight: jax.Array, bias=None, *, topk: int = 6,
         score_func: str = "softmax", route_scale: float = 1.0):
    """DeepSeek Gate forward. x: (tokens, dim); weight: (n_experts, dim)."""
    rows, dim = x.shape
    n_experts = weight.shape[0]
    assert weight.shape == (n_experts, dim)
    # TODO(synk): group-limited routing (n_expert_groups > 1) is not implemented;
    # default ModelArgs uses n_expert_groups == 1 so that branch is dead code.

    # x may be bf16 (kernel still accumulates logits in f32 via preferred_element_type);
    # the kernel is HBM-bound on x, so bf16 inputs ~halve wall-clock.
    wt = weight.astype(x.dtype).T                        # (dim, n_experts), tiny one-time transpose
    b = None if bias is None else bias.reshape(1, n_experts).astype(jnp.float32)

    vmem_cap = _vmem_capacity_bytes()
    block_rows = _pick_block_rows(rows, dim, n_experts, x.dtype.itemsize, vmem_cap)
    grid = (pl.cdiv(rows, block_rows),)                  # ragged tail handled by Pallas
    vmem_limit = int(min(96 << 20, (vmem_cap * 3) // 4))  # ~96 MiB v5e/v6e, ~48 MiB v7x

    kernel = functools.partial(_gate_kernel, topk=topk, score_func=score_func,
                               route_scale=route_scale, has_bias=b is not None)

    out_shape = (jax.ShapeDtypeStruct((rows, topk), x.dtype),
                 jax.ShapeDtypeStruct((rows, topk), jnp.int32))
    out_specs = [pl.BlockSpec((block_rows, topk), lambda i: (i, 0)),
                 pl.BlockSpec((block_rows, topk), lambda i: (i, 0))]

    def call(single_buffer_resident: bool):
        resident = dict(pipeline_mode=pl.Buffered(1)) if single_buffer_resident else {}
        in_specs = [pl.BlockSpec((block_rows, dim), lambda i: (i, 0)),
                    pl.BlockSpec((dim, n_experts), lambda i: (0, 0), **resident)]
        args = [x, wt]
        if b is not None:
            in_specs.append(pl.BlockSpec((1, n_experts), lambda i: (0, 0), **resident))
            args.append(b)
        return pl.pallas_call(
            kernel,
            out_shape=out_shape,
            grid_spec=pltpu.PrefetchScalarGridSpec(
                num_scalar_prefetch=0,
                grid=grid,
                in_specs=in_specs,
                out_specs=out_specs,
            ),
            compiler_params=pltpu.CompilerParams(
                dimension_semantics=("parallel",),       # load-bearing on v7x (2 TCs)
                vmem_limit_bytes=vmem_limit,
            ),
        )(*args)

    # Prefer single-buffering the grid-invariant weight/bias (VMEM headroom on
    # v7x); fall back to default double-buffering if per-BlockSpec pipeline_mode
    # is rejected by this JAX/Mosaic version.
    try:
        return jax.block_until_ready(call(True))
    except Exception:
        return call(False)


def gate_ref(x, weight, bias=None, *, topk=6, score_func="softmax", route_scale=1.0):
    scores = x @ weight.astype(x.dtype).T
    if bias is not None:
        scores = scores + bias
    if score_func == "softmax":
        scores = jax.nn.softmax(scores.astype(jnp.float32), axis=-1)
    else:
        scores = jax.nn.sigmoid(scores)
    original = scores
    _, idx = jax.lax.top_k(scores, topk)
    w = jnp.take_along_axis(original, idx, axis=-1)
    if score_func == "sigmoid":
        w = w / jnp.sum(w, axis=-1, keepdims=True)
    w = w * route_scale
    return w.astype(x.dtype), idx


if __name__ == "__main__":
    key = jax.random.PRNGKey(0)
    kx, kw = jax.random.split(key)

    # Small shapes consistent with the module (lane-aligned dim, 64 experts, top-6).
    n_tokens, dim, n_experts, topk = 16, 256, 64, 6
    x = jax.random.normal(kx, (n_tokens, dim), dtype=jnp.float32)
    std = math.sqrt(2.0 / (dim + n_experts))             # xavier_normal_ std
    weight = std * jax.random.normal(kw, (n_experts, dim), dtype=jnp.float32)

    w_out, i_out = gate(x, weight, bias=None, topk=topk,
                        score_func="softmax", route_scale=1.0)
    w_out, i_out = jax.block_until_ready((w_out, i_out))

    w_ref, i_ref = gate_ref(x, weight, bias=None, topk=topk,
                            score_func="softmax", route_scale=1.0)

    assert w_out.shape == (n_tokens, topk) and i_out.shape == (n_tokens, topk)
    # Tolerance covers the approximate EUP reciprocal and the low-mantissa-bit
    # truncation in the fused argmax packing (both << 1e-3 relative).
    assert jnp.allclose(w_out, w_ref, atol=3e-3, rtol=3e-3), "weights mismatch vs reference"
    assert jnp.array_equal(i_out, jnp.asarray(i_ref, dtype=i_out.dtype)), "indices mismatch vs reference"

    print("KERNEL_OK")
</pallas_src>

<mosaic_0001>
module attributes {stable_mosaic.version = 11 : i64} {
  func.func @_gate_kernel(%arg0: i32, %arg1: memref<8x256xf32, #tpu.memory_space<vmem>>, %arg2: memref<256x64xf32, #tpu.memory_space<vmem>>, %arg3: memref<8x6xf32, #tpu.memory_space<vmem>>, %arg4: memref<8x6xi32, #tpu.memory_space<vmem>>) attributes {dimension_semantics = [#tpu.dimension_semantics<parallel>], iteration_bounds = array<i64: 2>, scalar_prefetch = 0 : i64, scratch_operands = 0 : i64, tpu.core_type = #tpu.core_type<tc>, window_params = [{transform_indices = @transform_0, window_bounds = array<i64: 8, 256>}, {pipeline_mode = #tpu.pipeline_mode<synchronous>, transform_indices = @transform_1, window_bounds = array<i64: 256, 64>}, {transform_indices = @transform_2, window_bounds = array<i64: 8, 6>}, {transform_indices = @transform_3, window_bounds = array<i64: 8, 6>}]} {
    %c0 = arith.constant 0 : index
    %c0_0 = arith.constant 0 : index
    %0 = vector.load %arg1[%c0, %c0_0] : memref<8x256xf32, #tpu.memory_space<vmem>>, vector<8x256xf32>
    %c0_1 = arith.constant 0 : index
    %c0_2 = arith.constant 0 : index
    %1 = vector.load %arg2[%c0_1, %c0_2] : memref<256x64xf32, #tpu.memory_space<vmem>>, vector<256x64xf32>
    %cst = arith.constant dense<0.000000e+00> : vector<8x64xf32>
    %2 = tpu.matmul %0, %1, %cst {dimension_numbers = #tpu.dot_dimension_numbers<[1], [0], [0], [1], [0, 0, 1, 1], [], []>} : vector<8x256xf32>, vector<256x64xf32>, vector<8x64xf32> -> vector<8x64xf32>
    %cst_3 = arith.constant dense<0xFF800000> : vector<8xf32>
    %3 = vector.multi_reduction <maximumf>, %2, %cst_3 [1] : vector<8x64xf32> to vector<8xf32>
    %4 = vector.shape_cast %3 : vector<8xf32> to vector<8x1xf32>
    %5 = vector.broadcast %4 : vector<8x1xf32> to vector<8x64xf32>
    %6 = arith.subf %2, %5 : vector<8x64xf32>
    %7 = math.exp %6 : vector<8x64xf32>
    %cst_4 = arith.constant dense<0.000000e+00> : vector<8xf32>
    %8 = vector.multi_reduction <add>, %7, %cst_4 [1] : vector<8x64xf32> to vector<8xf32>
    %9 = vector.shape_cast %8 : vector<8xf32> to vector<8x1xf32>
    %10 = tpu.iota {dimensions = array<i32: 1>} : vector<8x64xi32>
    %c63_i32 = arith.constant 63 : i32
    %11 = vector.broadcast %c63_i32 : i32 to vector<8x64xi32>
    %12 = arith.subi %11, %10 : vector<8x64xi32>
    %13 = tpu.bitcast %7 : vector<8x64xf32> -> vector<8x64xi32>
    %c-64_i32 = arith.constant -64 : i32
    %14 = vector.broadcast %c-64_i32 : i32 to vector<8x64xi32>
    %15 = arith.andi %13, %14 : vector<8x64xi32>
    %16 = arith.ori %15, %12 : vector<8x64xi32>
    %17 = tpu.bitcast %16 : vector<8x64xi32> -> vector<8x64xf32>
    %cst_5 = arith.constant dense<0xFF800000> : vector<8xf32>
    %18 = vector.multi_reduction <maximumf>, %17, %cst_5 [1] : vector<8x64xf32> to vector<8xf32>
    %19 = vector.shape_cast %18 : vector<8xf32> to vector<8x1xf32>
    %20 = tpu.bitcast %19 : vector<8x1xf32> -> vector<8x1xi32>
    %c63_i32_6 = arith.constant 63 : i32
    %21 = vector.broadcast %c63_i32_6 : i32 to vector<8x1xi32>
    %22 = arith.andi %20, %21 : vector<8x1xi32>
    %c63_i32_7 = arith.constant 63 : i32
    %23 = vector.broadcast %c63_i32_7 : i32 to vector<8x1xi32>
    %24 = arith.subi %23, %22 : vector<8x1xi32>
    %c-64_i32_8 = arith.constant -64 : i32
    %25 = vector.broadcast %c-64_i32_8 : i32 to vector<8x1xi32>
    %26 = arith.andi %20, %25 : vector<8x1xi32>
    %27 = tpu.bitcast %26 : vector<8x1xi32> -> vector<8x1xf32>
    %28 = vector.broadcast %22 : vector<8x1xi32> to vector<8x64xi32>
    %29 = arith.cmpi eq, %12, %28 : vector<8x64xi32>
    %cst_9 = arith.constant -1.000000e+00 : f32
    %30 = vector.broadcast %cst_9 : f32 to vector<8x64xf32>
    %31 = arith.select %29, %30, %17 : vector<8x64xi1>, vector<8x64xf32>
    %cst_10 = arith.constant dense<0xFF800000> : vector<8xf32>
    %32 = vector.multi_reduction <maximumf>, %31, %cst_10 [1] : vector<8x64xf32> to vector<8xf32>
    %33 = vector.shape_cast %32 : vector<8xf32> to vector<8x1xf32>
    %34 = tpu.bitcast %33 : vector<8x1xf32> -> vector<8x1xi32>
    %c63_i32_11 = arith.constant 63 : i32
    %35 = vector.broadcast %c63_i32_11 : i32 to vector<8x1xi32>
    %36 = arith.andi %34, %35 : vector<8x1xi32>
    %c63_i32_12 = arith.constant 63 : i32
    %37 = vector.broadcast %c63_i32_12 : i32 to vector<8x1xi32>
    %38 = arith.subi %37, %36 : vector<8x1xi32>
    %c-64_i32_13 = arith.constant -64 : i32
    %39 = vector.broadcast %c-64_i32_13 : i32 to vector<8x1xi32>
    %40 = arith.andi %34, %39 : vector<8x1xi32>
    %41 = tpu.bitcast %40 : vector<8x1xi32> -> vector<8x1xf32>
    %42 = vector.broadcast %36 : vector<8x1xi32> to vector<8x64xi32>
    %43 = arith.cmpi eq, %12, %42 : vector<8x64xi32>
    %cst_14 = arith.constant -1.000000e+00 : f32
    %44 = vector.broadcast %cst_14 : f32 to vector<8x64xf32>
    %45 = arith.select %43, %44, %31 : vector<8x64xi1>, vector<8x64xf32>
    %cst_15 = arith.constant dense<0xFF800000> : vector<8xf32>
    %46 = vector.multi_reduction <maximumf>, %45, %cst_15 [1] : vector<8x64xf32> to vector<8xf32>
    %47 = vector.shape_cast %46 : vector<8xf32> to vector<8x1xf32>
    %48 = tpu.bitcast %47 : vector<8x1xf32> -> vector<8x1xi32>
    %c63_i32_16 = arith.constant 63 : i32
    %49 = vector.broadcast %c63_i32_16 : i32 to vector<8x1xi32>
    %50 = arith.andi %48, %49 : vector<8x1xi32>
    %c63_i32_17 = arith.constant 63 : i32
    %51 = vector.broadcast %c63_i32_17 : i32 to vector<8x1xi32>
    %52 = arith.subi %51, %50 : vector<8x1xi32>
    %c-64_i32_18 = arith.constant -64 : i32
    %53 = vector.broadcast %c-64_i32_18 : i32 to vector<8x1xi32>
    %54 = arith.andi %48, %53 : vector<8x1xi32>
    %55 = tpu.bitcast %54 : vector<8x1xi32> -> vector<8x1xf32>
    %56 = vector.broadcast %50 : vector<8x1xi32> to vector<8x64xi32>
    %57 = arith.cmpi eq, %12, %56 : vector<8x64xi32>
    %cst_19 = arith.constant -1.000000e+00 : f32
    %58 = vector.broadcast %cst_19 : f32 to vector<8x64xf32>
    %59 = arith.select %57, %58, %45 : vector<8x64xi1>, vector<8x64xf32>
    %cst_20 = arith.constant dense<0xFF800000> : vector<8xf32>
    %60 = vector.multi_reduction <maximumf>, %59, %cst_20 [1] : vector<8x64xf32> to vector<8xf32>
    %61 = vector.shape_cast %60 : vector<8xf32> to vector<8x1xf32>
    %62 = tpu.bitcast %61 : vector<8x1xf32> -> vector<8x1xi32>
    %c63_i32_21 = arith.constant 63 : i32
    %63 = vector.broadcast %c63_i32_21 : i32 to vector<8x1xi32>
    %64 = arith.andi %62, %63 : vector<8x1xi32>
    %c63_i32_22 = arith.constant 63 : i32
    %65 = vector.broadcast %c63_i32_22 : i32 to vector<8x1xi32>
    %66 = arith.subi %65, %64 : vector<8x1xi32>
    %c-64_i32_23 = arith.constant -64 : i32
    %67 = vector.broadcast %c-64_i32_23 : i32 to vector<8x1xi32>
    %68 = arith.andi %62, %67 : vector<8x1xi32>
    %69 = tpu.bitcast %68 : vector<8x1xi32> -> vector<8x1xf32>
    %70 = vector.broadcast %64 : vector<8x1xi32> to vector<8x64xi32>
    %71 = arith.cmpi eq, %12, %70 : vector<8x64xi32>
    %cst_24 = arith.constant -1.000000e+00 : f32
    %72 = vector.broadcast %cst_24 : f32 to vector<8x64xf32>
    %73 = arith.select %71, %72, %59 : vector<8x64xi1>, vector<8x64xf32>
    %cst_25 = arith.constant dense<0xFF800000> : vector<8xf32>
    %74 = vector.multi_reduction <maximumf>, %73, %cst_25 [1] : vector<8x64xf32> to vector<8xf32>
    %75 = vector.shape_cast %74 : vector<8xf32> to vector<8x1xf32>
    %76 = tpu.bitcast %75 : vector<8x1xf32> -> vector<8x1xi32>
    %c63_i32_26 = arith.constant 63 : i32
    %77 = vector.broadcast %c63_i32_26 : i32 to vector<8x1xi32>
    %78 = arith.andi %76, %77 : vector<8x1xi32>
    %c63_i32_27 = arith.constant 63 : i32
    %79 = vector.broadcast %c63_i32_27 : i32 to vector<8x1xi32>
    %80 = arith.subi %79, %78 : vector<8x1xi32>
    %c-64_i32_28 = arith.constant -64 : i32
    %81 = vector.broadcast %c-64_i32_28 : i32 to vector<8x1xi32>
    %82 = arith.andi %76, %81 : vector<8x1xi32>
    %83 = tpu.bitcast %82 : vector<8x1xi32> -> vector<8x1xf32>
    %84 = vector.broadcast %78 : vector<8x1xi32> to vector<8x64xi32>
    %85 = arith.cmpi eq, %12, %84 : vector<8x64xi32>
    %cst_29 = arith.constant -1.000000e+00 : f32
    %86 = vector.broadcast %cst_29 : f32 to vector<8x64xf32>
    %87 = arith.select %85, %86, %73 : vector<8x64xi1>, vector<8x64xf32>
    %cst_30 = arith.constant dense<0xFF800000> : vector<8xf32>
    %88 = vector.multi_reduction <maximumf>, %87, %cst_30 [1] : vector<8x64xf32> to vector<8xf32>
    %89 = vector.shape_cast %88 : vector<8xf32> to vector<8x1xf32>
    %90 = tpu.bitcast %89 : vector<8x1xf32> -> vector<8x1xi32>
    %c63_i32_31 = arith.constant 63 : i32
    %91 = vector.broadcast %c63_i32_31 : i32 to vector<8x1xi32>
    %92 = arith.andi %90, %91 : vector<8x1xi32>
    %c63_i32_32 = arith.constant 63 : i32
    %93 = vector.broadcast %c63_i32_32 : i32 to vector<8x1xi32>
    %94 = arith.subi %93, %92 : vector<8x1xi32>
    %c-64_i32_33 = arith.constant -64 : i32
    %95 = vector.broadcast %c-64_i32_33 : i32 to vector<8x1xi32>
    %96 = arith.andi %90, %95 : vector<8x1xi32>
    %97 = tpu.bitcast %96 : vector<8x1xi32> -> vector<8x1xf32>
    %98 = tpu.concatenate %27, %41, %55, %69, %83, %97 in 1 : vector<8x1xf32>, vector<8x1xf32>, vector<8x1xf32>, vector<8x1xf32>, vector<8x1xf32>, vector<8x1xf32> -> vector<8x6xf32>
    %99 = tpu.concatenate %24, %38, %52, %66, %80, %94 in 1 : vector<8x1xi32>, vector<8x1xi32>, vector<8x1xi32>, vector<8x1xi32>, vector<8x1xi32>, vector<8x1xi32> -> vector<8x6xi32>
    %100 = tpu.reciprocal %9 {approx = true} : vector<8x1xf32> -> vector<8x1xf32>
    %cst_34 = arith.constant 1.000000e+00 : f32
    %101 = vector.broadcast %cst_34 : f32 to vector<8x1xf32>
    %102 = arith.mulf %100, %101 : vector<8x1xf32>
    %103 = vector.broadcast %102 : vector<8x1xf32> to vector<8x6xf32>
    %104 = arith.mulf %98, %103 : vector<8x6xf32>
    %c0_35 = arith.constant 0 : index
    %c0_36 = arith.constant 0 : index
    %105 = vector.load %arg3[%c0_35, %c0_36] : memref<8x6xf32, #tpu.memory_space<vmem>>, vector<8x6xf32>
    tpu.vector_store %arg3[%c0_35, %c0_36], %104 {strides = array<i32>} : memref<8x6xf32, #tpu.memory_space<vmem>>, vector<8x6xf32>,
    %c0_37 = arith.constant 0 : index
    %c0_38 = arith.constant 0 : index
    %106 = vector.load %arg4[%c0_37, %c0_38] : memref<8x6xi32, #tpu.memory_space<vmem>>, vector<8x6xi32>
    tpu.vector_store %arg4[%c0_37, %c0_38], %99 {strides = array<i32>} : memref<8x6xi32, #tpu.memory_space<vmem>>, vector<8x6xi32>,
    return
  }
  func.func @transform_0(%arg0: i32) -> (i32, i32) {
    %c0_i32 = arith.constant 0 : i32
    %c0_i32_0 = arith.constant 0 : i32
    return %arg0, %c0_i32 : i32, i32
  }
  func.func @transform_1(%arg0: i32) -> (i32, i32) {
    %c0_i32 = arith.constant 0 : i32
    %c0_i32_0 = arith.constant 0 : i32
    %c0_i32_1 = arith.constant 0 : i32
    return %c0_i32, %c0_i32_0 : i32, i32
  }
  func.func @transform_2(%arg0: i32) -> (i32, i32) {
    %c0_i32 = arith.constant 0 : i32
    %c0_i32_0 = arith.constant 0 : i32
    return %arg0, %c0_i32 : i32, i32
  }
  func.func @transform_3(%arg0: i32) -> (i32, i32) {
    %c0_i32 = arith.constant 0 : i32
    %c0_i32_0 = arith.constant 0 : i32
    return %arg0, %c0_i32 : i32, i32
  }
}

module attributes {stable_mosaic.version = 11 : i64} {
  func.func @_gate_kernel(%arg0: i32, %arg1: memref<8x256xf32, #tpu.memory_space<vmem>>, %arg2: memref<256x64xf32, #tpu.memory_space<vmem>>, %arg3: memref<8x6xf32, #tpu.memory_space<vmem>>, %arg4: memref<8x6xi32, #tpu.memory_space<vmem>>) attributes {dimension_semantics = [#tpu.dimension_semantics<parallel>], iteration_bounds = array<i64: 2>, scalar_prefetch = 0 : i64, scratch_operands = 0 : i64, tpu.core_type = #tpu.core_type<tc>, window_params = [{transform_indices = @transform_0, window_bounds = array<i64: 8, 256>}, {pipeline_mode = #tpu.pipeline_mode<synchronous>, transform_indices = @transform_1, window_bounds = array<i64: 256, 64>}, {transform_indices = @transform_2, window_bounds = array<i64: 8, 6>}, {transform_indices = @transform_3, window_bounds = array<i64: 8, 6>}]} {
    %c0 = arith.constant 0 : index
    %c0_0 = arith.constant 0 : index
    %0 = vector.load %arg1[%c0, %c0_0] : memref<8x256xf32, #tpu.memory_space<vmem>>, vector<8x256xf32>
    %c0_1 = arith.constant 0 : index
    %c0_2 = arith.constant 0 : index
    %1 = vector.load %arg2[%c0_1, %c0_2] : memref<256x64xf32, #tpu.memory_space<vmem>>, vector<256x64xf32>
    %cst = arith.constant dense<0.000000e+00> : vector<8x64xf32>
    %2 = tpu.matmul %0, %1, %cst {dimension_numbers = #tpu.dot_dimension_numbers<[1], [0], [0], [1], [0, 0, 1, 1], [], []>} : vector<8x256xf32>, vector<256x64xf32>, vector<8x64xf32> -> vector<8x64xf32>
    %cst_3 = arith.constant dense<0xFF800000> : vector<8xf32>
    %3 = vector.multi_reduction <maximumf>, %2, %cst_3 [1] : vector<8x64xf32> to vector<8xf32>
    %4 = vector.shape_cast %3 : vector<8xf32> to vector<8x1xf32>
    %5 = vector.broadcast %4 : vector<8x1xf32> to vector<8x64xf32>
    %6 = arith.subf %2, %5 : vector<8x64xf32>
    %7 = math.exp %6 : vector<8x64xf32>
    %cst_4 = arith.constant dense<0.000000e+00> : vector<8xf32>
    %8 = vector.multi_reduction <add>, %7, %cst_4 [1] : vector<8x64xf32> to vector<8xf32>
    %9 = vector.shape_cast %8 : vector<8xf32> to vector<8x1xf32>
    %10 = tpu.iota {dimensions = array<i32: 1>} : vector<8x64xi32>
    %c63_i32 = arith.constant 63 : i32
    %11 = vector.broadcast %c63_i32 : i32 to vector<8x64xi32>
    %12 = arith.subi %11, %10 : vector<8x64xi32>
    %13 = tpu.bitcast %7 : vector<8x64xf32> -> vector<8x64xi32>
    %c-64_i32 = arith.constant -64 : i32
    %14 = vector.broadcast %c-64_i32 : i32 to vector<8x64xi32>
    %15 = arith.andi %13, %14 : vector<8x64xi32>
    %16 = arith.ori %15, %12 : vector<8x64xi32>
    %17 = tpu.bitcast %16 : vector<8x64xi32> -> vector<8x64xf32>
    %cst_5 = arith.constant dense<0xFF800000> : vector<8xf32>
    %18 = vector.multi_reduction <maximumf>, %17, %cst_5 [1] : vector<8x64xf32> to vector<8xf32>
    %19 = vector.shape_cast %18 : vector<8xf32> to vector<8x1xf32>
    %20 = tpu.bitcast %19 : vector<8x1xf32> -> vector<8x1xi32>
    %c63_i32_6 = arith.constant 63 : i32
    %21 = vector.broadcast %c63_i32_6 : i32 to vector<8x1xi32>
    %22 = arith.andi %20, %21 : vector<8x1xi32>
    %c63_i32_7 = arith.constant 63 : i32
    %23 = vector.broadcast %c63_i32_7 : i32 to vector<8x1xi32>
    %24 = arith.subi %23, %22 : vector<8x1xi32>
    %c-64_i32_8 = arith.constant -64 : i32
    %25 = vector.broadcast %c-64_i32_8 : i32 to vector<8x1xi32>
    %26 = arith.andi %20, %25 : vector<8x1xi32>
    %27 = tpu.bitcast %26 : vector<8x1xi32> -> vector<8x1xf32>
    %28 = vector.broadcast %22 : vector<8x1xi32> to vector<8x64xi32>
    %29 = arith.cmpi eq, %12, %28 : vector<8x64xi32>
    %cst_9 = arith.constant -1.000000e+00 : f32
    %30 = vector.broadcast %cst_9 : f32 to vector<8x64xf32>
    %31 = arith.select %29, %30, %17 : vector<8x64xi1>, vector<8x64xf32>
    %cst_10 = arith.constant dense<0xFF800000> : vector<8xf32>
    %32 = vector.multi_reduction <maximumf>, %31, %cst_10 [1] : vector<8x64xf32> to vector<8xf32>
    %33 = vector.shape_cast %32 : vector<8xf32> to vector<8x1xf32>
    %34 = tpu.bitcast %33 : vector<8x1xf32> -> vector<8x1xi32>
    %c63_i32_11 = arith.constant 63 : i32
    %35 = vector.broadcast %c63_i32_11 : i32 to vector<8x1xi32>
    %36 = arith.andi %34, %35 : vector<8x1xi32>
    %c63_i32_12 = arith.constant 63 : i32
    %37 = vector.broadcast %c63_i32_12 : i32 to vector<8x1xi32>
    %38 = arith.subi %37, %36 : vector<8x1xi32>
    %c-64_i32_13 = arith.constant -64 : i32
    %39 = vector.broadcast %c-64_i32_13 : i32 to vector<8x1xi32>
    %40 = arith.andi %34, %39 : vector<8x1xi32>
    %41 = tpu.bitcast %40 : vector<8x1xi32> -> vector<8x1xf32>
    %42 = vector.broadcast %36 : vector<8x1xi32> to vector<8x64xi32>
    %43 = arith.cmpi eq, %12, %42 : vector<8x64xi32>
    %cst_14 = arith.constant -1.000000e+00 : f32
    %44 = vector.broadcast %cst_14 : f32 to vector<8x64xf32>
    %45 = arith.select %43, %44, %31 : vector<8x64xi1>, vector<8x64xf32>
    %cst_15 = arith.constant dense<0xFF800000> : vector<8xf32>
    %46 = vector.multi_reduction <maximumf>, %45, %cst_15 [1] : vector<8x64xf32> to vector<8xf32>
    %47 = vector.shape_cast %46 : vector<8xf32> to vector<8x1xf32>
    %48 = tpu.bitcast %47 : vector<8x1xf32> -> vector<8x1xi32>
    %c63_i32_16 = arith.constant 63 : i32
    %49 = vector.broadcast %c63_i32_16 : i32 to vector<8x1xi32>
    %50 = arith.andi %48, %49 : vector<8x1xi32>
    %c63_i32_17 = arith.constant 63 : i32
    %51 = vector.broadcast %c63_i32_17 : i32 to vector<8x1xi32>
    %52 = arith.subi %51, %50 : vector<8x1xi32>
    %c-64_i32_18 = arith.constant -64 : i32
    %53 = vector.broadcast %c-64_i32_18 : i32 to vector<8x1xi32>
    %54 = arith.andi %48, %53 : vector<8x1xi32>
    %55 = tpu.bitcast %54 : vector<8x1xi32> -> vector<8x1xf32>
    %56 = vector.broadcast %50 : vector<8x1xi32> to vector<8x64xi32>
    %57 = arith.cmpi eq, %12, %56 : vector<8x64xi32>
    %cst_19 = arith.constant -1.000000e+00 : f32
    %58 = vector.broadcast %cst_19 : f32 to vector<8x64xf32>
    %59 = arith.select %57, %58, %45 : vector<8x64xi1>, vector<8x64xf32>
    %cst_20 = arith.constant dense<0xFF800000> : vector<8xf32>
    %60 = vector.multi_reduction <maximumf>, %59, %cst_20 [1] : vector<8x64xf32> to vector<8xf32>
    %61 = vector.shape_cast %60 : vector<8xf32> to vector<8x1xf32>
    %62 = tpu.bitcast %61 : vector<8x1xf32> -> vector<8x1xi32>
    %c63_i32_21 = arith.constant 63 : i32
    %63 = vector.broadcast %c63_i32_21 : i32 to vector<8x1xi32>
    %64 = arith.andi %62, %63 : vector<8x1xi32>
    %c63_i32_22 = arith.constant 63 : i32
    %65 = vector.broadcast %c63_i32_22 : i32 to vector<8x1xi32>
    %66 = arith.subi %65, %64 : vector<8x1xi32>
    %c-64_i32_23 = arith.constant -64 : i32
    %67 = vector.broadcast %c-64_i32_23 : i32 to vector<8x1xi32>
    %68 = arith.andi %62, %67 : vector<8x1xi32>
    %69 = tpu.bitcast %68 : vector<8x1xi32> -> vector<8x1xf32>
    %70 = vector.broadcast %64 : vector<8x1xi32> to vector<8x64xi32>
    %71 = arith.cmpi eq, %12, %70 : vector<8x64xi32>
    %cst_24 = arith.constant -1.000000e+00 : f32
    %72 = vector.broadcast %cst_24 : f32 to vector<8x64xf32>
    %73 = arith.select %71, %72, %59 : vector<8x64xi1>, vector<8x64xf32>
    %cst_25 = arith.constant dense<0xFF800000> : vector<8xf32>
    %74 = vector.multi_reduction <maximumf>, %73, %cst_25 [1] : vector<8x64xf32> to vector<8xf32>
    %75 = vector.shape_cast %74 : vector<8xf32> to vector<8x1xf32>
    %76 = tpu.bitcast %75 : vector<8x1xf32> -> vector<8x1xi32>
    %c63_i32_26 = arith.constant 63 : i32
    %77 = vector.broadcast %c63_i32_26 : i32 to vector<8x1xi32>
    %78 = arith.andi %76, %77 : vector<8x1xi32>
    %c63_i32_27 = arith.constant 63 : i32
    %79 = vector.broadcast %c63_i32_27 : i32 to vector<8x1xi32>
    %80 = arith.subi %79, %78 : vector<8x1xi32>
    %c-64_i32_28 = arith.constant -64 : i32
    %81 = vector.broadcast %c-64_i32_28 : i32 to vector<8x1xi32>
    %82 = arith.andi %76, %81 : vector<8x1xi32>
    %83 = tpu.bitcast %82 : vector<8x1xi32> -> vector<8x1xf32>
    %84 = vector.broadcast %78 : vector<8x1xi32> to vector<8x64xi32>
    %85 = arith.cmpi eq, %12, %84 : vector<8x64xi32>
    %cst_29 = arith.constant -1.000000e+00 : f32
    %86 = vector.broadcast %cst_29 : f32 to vector<8x64xf32>
    %87 = arith.select %85, %86, %73 : vector<8x64xi1>, vector<8x64xf32>
    %cst_30 = arith.constant dense<0xFF800000> : vector<8xf32>
    %88 = vector.multi_reduction <maximumf>, %87, %cst_30 [1] : vector<8x64xf32> to vector<8xf32>
    %89 = vector.shape_cast %88 : vector<8xf32> to vector<8x1xf32>
    %90 = tpu.bitcast %89 : vector<8x1xf32> -> vector<8x1xi32>
    %c63_i32_31 = arith.constant 63 : i32
    %91 = vector.broadcast %c63_i32_31 : i32 to vector<8x1xi32>
    %92 = arith.andi %90, %91 : vector<8x1xi32>
    %c63_i32_32 = arith.constant 63 : i32
    %93 = vector.broadcast %c63_i32_32 : i32 to vector<8x1xi32>
    %94 = arith.subi %93, %92 : vector<8x1xi32>
    %c-64_i32_33 = arith.constant -64 : i32
    %95 = vector.broadcast %c-64_i32_33 : i32 to vector<8x1xi32>
    %96 = arith.andi %90, %95 : vector<8x1xi32>
    %97 = tpu.bitcast %96 : vector<8x1xi32> -> vector<8x1xf32>
    %98 = tpu.concatenate %27, %41, %55, %69, %83, %97 in 1 : vector<8x1xf32>, vector<8x1xf32>, vector<8x1xf32>, vector<8x1xf32>, vector<8x1xf32>, vector<8x1xf32> -> vector<8x6xf32>
    %99 = tpu.concatenate %24, %38, %52, %66, %80, %94 in 1 : vector<8x1xi32>, vector<8x1xi32>, vector<8x1xi32>, vector<8x1xi32>, vector<8x1xi32>, vector<8x1xi32> -> vector<8x6xi32>
    %100 = tpu.reciprocal %9 {approx = true} : vector<8x1xf32> -> vector<8x1xf32>
    %cst_34 = arith.constant 1.000000e+00 : f32
    %101 = vector.broadcast %cst_34 : f32 to vector<8x1xf32>
    %102 = arith.mulf %100, %101 : vector<8x1xf32>
    %103 = vector.broadcast %102 : vector<8x1xf32> to vector<8x6xf32>
    %104 = arith.mulf %98, %103 : vector<8x6xf32>
    %c0_35 = arith.constant 0 : index
    %c0_36 = arith.constant 0 : index
    %105 = vector.load %arg3[%c0_35, %c0_36] : memref<8x6xf32, #tpu.memory_space<vmem>>, vector<8x6xf32>
    tpu.vector_store %arg3[%c0_35, %c0_36], %104 {strides = array<i32>} : memref<8x6xf32, #tpu.memory_space<vmem>>, vector<8x6xf32>,
    %c0_37 = arith.constant 0 : index
    %c0_38 = arith.constant 0 : index
    %106 = vector.load %arg4[%c0_37, %c0_38] : memref<8x6xi32, #tpu.memory_space<vmem>>, vector<8x6xi32>
    tpu.vector_store %arg4[%c0_37, %c0_38], %99 {strides = array<i32>} : memref<8x6xi32, #tpu.memory_space<vmem>>, vector<8x6xi32>,
    return
  }
  func.func @transform_0(%arg0: i32) -> (i32, i32) {
    %c0_i32 = arith.constant 0 : i32
    %c0_i32_0 = arith.constant 0 : i32
    return %arg0, %c0_i32 : i32, i32
  }
  func.func @transform_1(%arg0: i32) -> (i32, i32) {
    %c0_i32 = arith.constant 0 : i32
    %c0_i32_0 = arith.constant 0 : i32
    %c0_i32_1 = arith.constant 0 : i32
    return %c0_i32, %c0_i32_0 : i32, i32
  }
  func.func @transform_2(%arg0: i32) -> (i32, i32) {
    %c0_i32 = arith.constant 0 : i32
    %c0_i32_0 = arith.constant 0 : i32
    return %arg0, %c0_i32 : i32, i32
  }
  func.func @transform_3(%arg0: i32) -> (i32, i32) {
    %c0_i32 = arith.constant 0 : i32
    %c0_i32_0 = arith.constant 0 : i32
    return %arg0, %c0_i32 : i32, i32
  }
}

</mosaic_0001>

<bundles_post_ra>
// kernel: tpu_custom_call.1
= control target key start
LH: loop header
LB: loop body
LE: loop exit
PB: predicated region body
PF: predicated region fallthrough
CT: control target
= control target key end

     0   :  { %s582_s12 = smov 0   ;;  %s722_s0 = inlined_call_operand.vmem [shape: f32[16,256], index: 0, kind: input, shape index: {}]   ;;  %s723_s1 = inlined_call_operand.vmem [shape: f32[256,64], index: 1, kind: input, shape index: {}]   ;;  %s724_s2 = inlined_call_operand.vmem [shape: f32[16,6], index: 2, kind: output, shape index: {0}]   ;;  %s725_s3 = inlined_call_operand.vmem [shape: s32[16,6], index: 3, kind: output, shape index: {1}]  }
   0x1 LB: > { %s463_s13 = sadd.s32 4294967295, %s560_s12   ;;  %p467_p0 = scmp.ge.s32.totalorder %s560_s12, 1  ;;  %s560_s12 = sphi %s582_s12, %s14_s12  }
   0x2   : > { %p140_p1 = scmp.lt.s32.totalorder %s560_s12, 3 }
   0x4   : > { %p141_p2 = pnand %p467_p0, %p140_p1 }
   0x5   : > { %v198_v0 = vld [vmem:[%s723_s1 + $0x80] sm:$0xff] (!%p141_p2)  ;;  %v199_v1 = vld [vmem:[%s723_s1 + $0x88] sm:$0xff] (!%p141_p2)  ;;  %p167_p3 = scmp.lt.s32.totalorder (!%p141_p2), %s463_s13, 1  ;;  %v200_v5 = vld [vmem:[%s723_s1 + $0x90] sm:$0xff] (!%p141_p2)  ;;  %vm284_vm0 = vcmask (!%p141_p2), 523264   ;;  %v294_v57 = vlaneseq (!%p141_p2)  ;;  %vm359_vm3 = vcmask (!%p141_p2), 7168  }
   0x6   : > { %144 = sbr.rel (%p141_p2) target bundleno = 1301 (0x515), region = 28  ;;  %v182_v2 = vld [vmem:[%s723_s1] sm:$0xff] (!%p141_p2)  ;;  %v510_v3 = vpack.c.bf16 (!%p141_p2), %v199_v1, %v198_v0  ;;  %v183_v4 = vld [vmem:[%s723_s1 + $0x8] sm:$0xff] (!%p141_p2)  ;;  %v201_v6 = vld [vmem:[%s723_s1 + $0x98] sm:$0xff] (!%p141_p2)  ;;  %vm361_vm5 = vcmask (!%p141_p2), 15360   ;;  %vm363_vm7 = vcmask (!%p141_p2), 23552  }
   0x7   : > { %v512_v7 = vpack.c.bf16 (!%p141_p2), %v183_v4, %v182_v2  ;;  %v514_v8 = vpack.c.bf16 (!%p141_p2), %v201_v6, %v200_v5  ;;  %v184_v9 = vld [vmem:[%s723_s1 + $0x10] sm:$0xff] (!%p141_p2)  ;;  %v185_v10 = vld [vmem:[%s723_s1 + $0x18] sm:$0xff] (!%p141_p2)  ;;  %v202_v11 = vld [vmem:[%s723_s1 + $0xa0] sm:$0xff] (!%p141_p2)  ;;  %v295_v58 = vand.u32 (!%p141_p2), 127, %v294_v57  ;;  %vm365_vm9 = vcmask (!%p141_p2), 31744  }
   0x8   : > { %511 = vmatprep.subr.bf16.mxu0 (!%p141_p2), %v510_v3  ;;  %v203_v12 = vld [vmem:[%s723_s1 + $0xa8] sm:$0xff] (!%p141_p2)  ;;  %v516_v13 = vpack.c.bf16 (!%p141_p2), %v185_v10, %v184_v9  ;;  %v186_v15 = vld [vmem:[%s723_s1 + $0x20] sm:$0xff] (!%p141_p2)  ;;  %v204_v17 = vld [vmem:[%s723_s1 + $0xb0] sm:$0xff] (!%p141_p2)  ;;  %vm367_vm10 = vcmask (!%p141_p2), 39936   ;;  %vm376_vm11 = vcmask (!%p141_p2), 48128  }
   0x9   : > { %513 = vmatpush3.bf16.msra.mxu0 (!%p141_p2), %v512_v7  ;;  %v518_v14 = vpack.c.bf16 (!%p141_p2), %v203_v12, %v202_v11  ;;  %v187_v16 = vld [vmem:[%s723_s1 + $0x28] sm:$0xff] (!%p141_p2)  ;;  %v205_v18 = vld [vmem:[%s723_s1 + $0xb8] sm:$0xff] (!%p141_p2)  ;;  %v188_v21 = vld [vmem:[%s723_s1 + $0x30] sm:$0xff] (!%p141_p2)  ;;  %v296_v59 = vsub.s32 (!%p141_p2), 63, %v295_v58 }
   0xa   : > { %515 = vmatprep.subr.bf16.mxu0 (!%p141_p2), %v514_v8  ;;  %v520_v19 = vpack.c.bf16 (!%p141_p2), %v187_v16, %v186_v15  ;;  %v522_v20 = vpack.c.bf16 (!%p141_p2), %v205_v18, %v204_v17  ;;  %v189_v22 = vld [vmem:[%s723_s1 + $0x38] sm:$0xff] (!%p141_p2)  ;;  %v206_v23 = vld [vmem:[%s723_s1 + $0xc0] sm:$0xff] (!%p141_p2)  ;;  %v207_v24 = vld [vmem:[%s723_s1 + $0xc8] sm:$0xff] (!%p141_p2) }
   0xb   : > { %v524_v26 = vpack.c.bf16 (!%p141_p2), %v189_v22, %v188_v21  ;;  %v526_v27 = vpack.c.bf16 (!%p141_p2), %v207_v24, %v206_v23  ;;  %v190_v28 = vld [vmem:[%s723_s1 + $0x40] sm:$0xff] (!%p141_p2)  ;;  %v191_v29 = vld [vmem:[%s723_s1 + $0x48] sm:$0xff] (!%p141_p2)  ;;  %v208_v30 = vld [vmem:[%s723_s1 + $0xd0] sm:$0xff] (!%p141_p2) }
   0xc   : > { %v209_v31 = vld [vmem:[%s723_s1 + $0xd8] sm:$0xff] (!%p141_p2)  ;;  %v528_v32 = vpack.c.bf16 (!%p141_p2), %v191_v29, %v190_v28  ;;  %v192_v34 = vld [vmem:[%s723_s1 + $0x50] sm:$0xff] (!%p141_p2)  ;;  %v210_v36 = vld [vmem:[%s723_s1 + $0xe0] sm:$0xff] (!%p141_p2) }
   0xd   : > { %s727_s13 = smov (!%p167_p3, %s463_s13), 1  ;;  %517 = vmatpush3.bf16.msra.mxu0 %v516_v13  ;;  %v530_v33 = vpack.c.bf16 %v209_v31, %v208_v30  ;;  %v193_v35 = vld [vmem:[%s723_s1 + $0x58] sm:$0xff]  ;;  %v211_v37 = vld [vmem:[%s723_s1 + $0xe8] sm:$0xff]  ;;  %v194_v40 = vld [vmem:[%s723_s1 + $0x60] sm:$0xff] }
   0xe   : > { %s474_s7 = sshll.u32 %s727_s13, 4  ;;  %519 = vmatprep.subr.bf16.mxu0 %v518_v14  ;;  %v532_v38 = vpack.c.bf16 %v193_v35, %v192_v34  ;;  %v534_v39 = vpack.c.bf16 %v211_v37, %v210_v36  ;;  %v195_v41 = vld [vmem:[%s723_s1 + $0x68] sm:$0xff]  ;;  %v212_v42 = vld [vmem:[%s723_s1 + $0xf0] sm:$0xff]  ;;  %v213_v43 = vld [vmem:[%s723_s1 + $0xf8] sm:$0xff] }
   0xf   : > { %s638_s20 = scalar_lea.vmem %s722_s0, %s474_s7  ;;  %v536_v44 = vpack.c.bf16 %v195_v41, %v194_v40  ;;  %v538_v45 = vpack.c.bf16 %v213_v43, %v212_v42  ;;  %v196_v46 = vld [vmem:[%s723_s1 + $0x70] sm:$0xff]  ;;  %v197_v47 = vld [vmem:[%s723_s1 + $0x78] sm:$0xff] }
  0x10   : > { %v181_v25 = vld [vmem:[%s638_s20 + $0x8] sm:$0xff]  ;;  %v540_v48 = vpack.c.bf16 %v197_v47, %v196_v46  ;;  %v180_v49 = vld [vmem:[%s638_s20] sm:$0xff]  ;;  %s470_s20 = sshll.u32 %s727_s13, 3 }
  0x11   : > { %278 = vmatprep.mubr.f32.mxu0 %v181_v25  ;;  %521 = vmatpush3.bf16.msra.mxu0 %v520_v19  ;;  %s175_s8 = scalar_lea.vmem %s724_s2, %s470_s20  ;;  %s179_s11 = scalar_lea.vmem %s725_s3, %s470_s20 }
  0x12   : > { %523 = vmatprep.subr.bf16.mxu0 %v522_v20 }
  0x15   : > { %525 = vmatpush3.bf16.msra.mxu0 %v524_v26 }
  0x16   : > { %527 = vmatprep.subr.bf16.mxu0 %v526_v27 }
  0x19   : > { %529 = vmatpush3.bf16.msra.mxu0 %v528_v32 }
  0x1a   : > { %531 = vmatprep.subr.bf16.mxu0 %v530_v33 }
  0x1d   : > { %533 = vmatpush3.bf16.msra.mxu0 %v532_v38 }
  0x1e   : > { %535 = vmatprep.subr.bf16.mxu0 %v534_v39 }
  0x21   : > { %537 = vmatpush3.bf16.msra.mxu0 %v536_v44 }
  0x22   : > { %539 = vmatprep.subr.bf16.mxu0 %v538_v45 }
  0x25   : > { %541 = vmatpush3.bf16.msra.mxu0 %v540_v48 }
  0x28   : > { %279 = vmatmul.mubr.f32.vlgmr.msra.gmra.mrb[0].mxu0 %v180_v49 }
  0xfb   : > { %v507_v50 = vpop.f32.mrb[0].mxu0 }
  0xfc   : > { %v508_v51 = vpop.f32.mrb[1].mxu0 }
  0xfd   : > { %v509_v52 = vadd.f32 %v508_v51, %v507_v50 }
  0xff   : > { %v285_v53 = vsel %vm284_vm0, %v509_v52, -inf }
 0x100   : > { %286 = vmax.xlane.f32.xlu0 %v285_v53 }
 0x18d   : > { %v287_v54 = vpop.xlane.xlu0 %286 }
 0x18e   : > { %v288_v55 = vsub.f32 %v509_v52, %v287_v54 }
 0x190   : > { %v289_v56 = vmul.f32 1.442695, %v288_v55 }
 0x192   : > { %550 = vpow2.f32 %v289_v56 }
 0x19c   : > { %v551_v60 = vpop.eup %550 }
 0x19d   : > { %v298_v61 = vand.u32 4294967232, %v551_v60  ;;  %v291_v17 = vsel %vm284_vm0, %v551_v60, 0.0 }
 0x19f   : > { %v299_v62 = vor.u32 %v298_v61, %v296_v59 }
 0x1a1   : > { %v301_v63 = vsel %vm284_vm0, %v299_v62, -inf }
 0x1a2   : > { %302 = vmax.xlane.f32.xlu0 %v301_v63 }
 0x22f   : > { %v303_v0 = vpop.xlane.xlu0 %302 }
 0x230   : > { %v305_v1 = vand.u32 63, %v303_v0  ;;  %v307_v33 = vand.u32 4294967232, %v303_v0 }
 0x232   : > { %vm309_vm1 = vcmp.eq.s32.totalorder %v296_v59, %v305_v1  ;;  %v306_v6 = vsub.s32 63, %v305_v1 }
 0x233   : > { %v310_v2 = vsel %vm309_vm1, -1.0, %v299_v62 }
 0x234   : > { %v311_v3 = vsel %vm284_vm0, %v310_v2, -inf }
 0x235   : > { %312 = vmax.xlane.f32.xlu1 %v311_v3 }
 0x2c2   : > { %v313_v4 = vpop.xlane.xlu1 %312 }
 0x2c3   : > { %v315_v5 = vand.u32 63, %v313_v4  ;;  %v317_v31 = vand.u32 4294967232, %v313_v4 }
 0x2c5   : > { %v316_v7 = vsub.s32 63, %v315_v5  ;;  %vm319_vm2 = vcmp.eq.s32.totalorder %v296_v59, %v315_v5  ;;  %v360_v36 = vsel %vm359_vm3, %v307_v33, %v317_v31 }
 0x2c6   : > { %v320_v8 = vsel %vm319_vm2, -1.0, %v310_v2 }
 0x2c7   : > { %v369_v9 = vsel %vm359_vm3, %v306_v6, %v316_v7  ;;  %v321_v10 = vsel %vm284_vm0, %v320_v8, -inf }
 0x2c8   : > { %322 = vmax.xlane.f32.xlu1 %v321_v10 }
 0x355   : > { %v323_v11 = vpop.xlane.xlu1 %322 }
 0x356   : > { %v325_v12 = vand.u32 63, %v323_v11  ;;  %v327_v32 = vand.u32 4294967232, %v323_v11 }
 0x358   : > { %v326_v13 = vsub.s32 63, %v325_v12  ;;  %vm329_vm4 = vcmp.eq.s32.totalorder %v296_v59, %v325_v12  ;;  %v362_v37 = vsel %vm361_vm5, %v360_v36, %v327_v32 }
 0x359   : > { %v330_v14 = vsel %vm329_vm4, -1.0, %v320_v8 }
 0x35a   : > { %v370_v15 = vsel %vm361_vm5, %v369_v9, %v326_v13  ;;  %v331_v16 = vsel %vm284_vm0, %v330_v14, -inf }
 0x35b   : > { %332 = vmax.xlane.f32.xlu0 %v331_v16 }
 0x35f   : > { %292 = vadd.xlane.f32.xlu0 %v291_v17 }
 0x3e8   : > { %v333_v18 = vpop.xlane.xlu0 %332 }
 0x3e9   : > { %v335_v19 = vand.u32 63, %v333_v18  ;;  %v337_v34 = vand.u32 4294967232, %v333_v18 }
 0x3eb   : > { %v336_v20 = vsub.s32 63, %v335_v19  ;;  %vm339_vm6 = vcmp.eq.s32.totalorder %v296_v59, %v335_v19  ;;  %v364_v39 = vsel %vm363_vm7, %v362_v37, %v337_v34 }
 0x3ec   : > { %v340_v21 = vsel %vm339_vm6, -1.0, %v330_v14  ;;  %v293_v30 = vpop.xlane.xlu0 %292 }
 0x3ed   : > { %v371_v22 = vsel %vm363_vm7, %v370_v15, %v336_v20  ;;  %v341_v23 = vsel %vm284_vm0, %v340_v21, -inf  ;;  %552 = vrcp.f32 %v293_v30 }
 0x3ee   : > { %342 = vmax.xlane.f32.xlu1 %v341_v23 }
 0x3f7   : > { %v553_v43 = vpop.eup %552 }
 0x47b   : > { %v343_v24 = vpop.xlane.xlu1 %342 }
 0x47c   : > { %v345_v25 = vand.u32 63, %v343_v24  ;;  %v347_v35 = vand.u32 4294967232, %v343_v24 }
 0x47e   : > { %v346_v26 = vsub.s32 63, %v345_v25  ;;  %vm349_vm8 = vcmp.eq.s32.totalorder %v296_v59, %v345_v25  ;;  %v366_v42 = vsel %vm365_vm9, %v364_v39, %v347_v35 }
 0x47f   : > { %v350_v27 = vsel %vm349_vm8, -1.0, %v340_v21 }
 0x480   : > { %v351_v28 = vsel %vm284_vm0, %v350_v27, -inf  ;;  %v372_v29 = vsel %vm365_vm9, %v371_v22, %v346_v26 }
 0x481   : > { %352 = vmax.xlane.f32.xlu1 %v351_v28 }
 0x50e   : > { %v353_v38 = vpop.xlane.xlu1 %352 }
 0x50f   : > { %v355_v40 = vand.u32 63, %v353_v38  ;;  %v357_v41 = vand.u32 4294967232, %v353_v38 }
 0x511   : > { %v356_v44 = vsub.s32 63, %v355_v40  ;;  %v368_v45 = vsel %vm367_vm10, %v366_v42, %v357_v41 }
 0x512   : > { %v375_v46 = vmul.f32 %v553_v43, %v368_v45 }
 0x513   : > { %v373_v47 = vsel %vm367_vm10, %v372_v29, %v356_v44 }
 0x514   : > { %377 = vst.msk [vmem:[%s175_s8] sm:$0xff] %vm376_vm11, %v375_v46  ;;  %378 = vst.msk [vmem:[%s179_s11] sm:$0xff] %vm376_vm11, %v373_v47 }
 0x515 PF: > { %s14_s12 = sadd.s32 1, %s560_s12  }
 0x516   : > { %p11_p4 = scmp.ge.s32.totalorder %s14_s12, 4  }
 0x518   :  { %13 = sbr.rel (!%p11_p4) target bundleno = 1 (0x1), region = 70 }

// kernel: tpu_custom_call.1
= control target key start
LH: loop header
LB: loop body
LE: loop exit
PB: predicated region body
PF: predicated region fallthrough
CT: control target
= control target key end

     0   :  { %s582_s12 = smov 0   ;;  %s722_s0 = inlined_call_operand.vmem [shape: f32[16,256], index: 0, kind: input, shape index: {}]   ;;  %s723_s1 = inlined_call_operand.vmem [shape: f32[256,64], index: 1, kind: input, shape index: {}]   ;;  %s724_s2 = inlined_call_operand.vmem [shape: f32[16,6], index: 2, kind: output, shape index: {0}]   ;;  %s725_s3 = inlined_call_operand.vmem [shape: s32[16,6], index: 3, kind: output, shape index: {1}]  }
   0x1 LB: > { %s463_s13 = sadd.s32 4294967295, %s560_s12   ;;  %p467_p0 = scmp.ge.s32.totalorder %s560_s12, 1  ;;  %s560_s12 = sphi %s582_s12, %s14_s12  }
   0x2   : > { %p140_p1 = scmp.lt.s32.totalorder %s560_s12, 3 }
   0x4   : > { %p141_p2 = pnand %p467_p0, %p140_p1 }
   0x5   : > { %v198_v0 = vld [vmem:[%s723_s1 + $0x80] sm:$0xff] (!%p141_p2)  ;;  %v199_v1 = vld [vmem:[%s723_s1 + $0x88] sm:$0xff] (!%p141_p2)  ;;  %p167_p3 = scmp.lt.s32.totalorder (!%p141_p2), %s463_s13, 1  ;;  %v200_v5 = vld [vmem:[%s723_s1 + $0x90] sm:$0xff] (!%p141_p2)  ;;  %vm284_vm0 = vcmask (!%p141_p2), 523264   ;;  %v294_v57 = vlaneseq (!%p141_p2)  ;;  %vm359_vm3 = vcmask (!%p141_p2), 7168  }
   0x6   : > { %144 = sbr.rel (%p141_p2) target bundleno = 1301 (0x515), region = 28  ;;  %v182_v2 = vld [vmem:[%s723_s1] sm:$0xff] (!%p141_p2)  ;;  %v510_v3 = vpack.c.bf16 (!%p141_p2), %v199_v1, %v198_v0  ;;  %v183_v4 = vld [vmem:[%s723_s1 + $0x8] sm:$0xff] (!%p141_p2)  ;;  %v201_v6 = vld [vmem:[%s723_s1 + $0x98] sm:$0xff] (!%p141_p2)  ;;  %vm361_vm5 = vcmask (!%p141_p2), 15360   ;;  %vm363_vm7 = vcmask (!%p141_p2), 23552  }
   0x7   : > { %v512_v7 = vpack.c.bf16 (!%p141_p2), %v183_v4, %v182_v2  ;;  %v514_v8 = vpack.c.bf16 (!%p141_p2), %v201_v6, %v200_v5  ;;  %v184_v9 = vld [vmem:[%s723_s1 + $0x10] sm:$0xff] (!%p141_p2)  ;;  %v185_v10 = vld [vmem:[%s723_s1 + $0x18] sm:$0xff] (!%p141_p2)  ;;  %v202_v11 = vld [vmem:[%s723_s1 + $0xa0] sm:$0xff] (!%p141_p2)  ;;  %v295_v58 = vand.u32 (!%p141_p2), 127, %v294_v57  ;;  %vm365_vm9 = vcmask (!%p141_p2), 31744  }
   0x8   : > { %511 = vmatprep.subr.bf16.mxu0 (!%p141_p2), %v510_v3  ;;  %v203_v12 = vld [vmem:[%s723_s1 + $0xa8] sm:$0xff] (!%p141_p2)  ;;  %v516_v13 = vpack.c.bf16 (!%p141_p2), %v185_v10, %v184_v9  ;;  %v186_v15 = vld [vmem:[%s723_s1 + $0x20] sm:$0xff] (!%p141_p2)  ;;  %v204_v17 = vld [vmem:[%s723_s1 + $0xb0] sm:$0xff] (!%p141_p2)  ;;  %vm367_vm10 = vcmask (!%p141_p2), 39936   ;;  %vm376_vm11 = vcmask (!%p141_p2), 48128  }
   0x9   : > { %513 = vmatpush3.bf16.msra.mxu0 (!%p141_p2), %v512_v7  ;;  %v518_v14 = vpack.c.bf16 (!%p141_p2), %v203_v12, %v202_v11  ;;  %v187_v16 = vld [vmem:[%s723_s1 + $0x28] sm:$0xff] (!%p141_p2)  ;;  %v205_v18 = vld [vmem:[%s723_s1 + $0xb8] sm:$0xff] (!%p141_p2)  ;;  %v188_v21 = vld [vmem:[%s723_s1 + $0x30] sm:$0xff] (!%p141_p2)  ;;  %v296_v59 = vsub.s32 (!%p141_p2), 63, %v295_v58 }
   0xa   : > { %515 = vmatprep.subr.bf16.mxu0 (!%p141_p2), %v514_v8  ;;  %v520_v19 = vpack.c.bf16 (!%p141_p2), %v187_v16, %v186_v15  ;;  %v522_v20 = vpack.c.bf16 (!%p141_p2), %v205_v18, %v204_v17  ;;  %v189_v22 = vld [vmem:[%s723_s1 + $0x38] sm:$0xff] (!%p141_p2)  ;;  %v206_v23 = vld [vmem:[%s723_s1 + $0xc0] sm:$0xff] (!%p141_p2)  ;;  %v207_v24 = vld [vmem:[%s723_s1 + $0xc8] sm:$0xff] (!%p141_p2) }
   0xb   : > { %v524_v26 = vpack.c.bf16 (!%p141_p2), %v189_v22, %v188_v21  ;;  %v526_v27 = vpack.c.bf16 (!%p141_p2), %v207_v24, %v206_v23  ;;  %v190_v28 = vld [vmem:[%s723_s1 + $0x40] sm:$0xff] (!%p141_p2)  ;;  %v191_v29 = vld [vmem:[%s723_s1 + $0x48] sm:$0xff] (!%p141_p2)  ;;  %v208_v30 = vld [vmem:[%s723_s1 + $0xd0] sm:$0xff] (!%p141_p2) }
   0xc   : > { %v209_v31 = vld [vmem:[%s723_s1 + $0xd8] sm:$0xff] (!%p141_p2)  ;;  %v528_v32 = vpack.c.bf16 (!%p141_p2), %v191_v29, %v190_v28  ;;  %v192_v34 = vld [vmem:[%s723_s1 + $0x50] sm:$0xff] (!%p141_p2)  ;;  %v210_v36 = vld [vmem:[%s723_s1 + $0xe0] sm:$0xff] (!%p141_p2) }
   0xd   : > { %s727_s13 = smov (!%p167_p3, %s463_s13), 1  ;;  %517 = vmatpush3.bf16.msra.mxu0 %v516_v13  ;;  %v530_v33 = vpack.c.bf16 %v209_v31, %v208_v30  ;;  %v193_v35 = vld [vmem:[%s723_s1 + $0x58] sm:$0xff]  ;;  %v211_v37 = vld [vmem:[%s723_s1 + $0xe8] sm:$0xff]  ;;  %v194_v40 = vld [vmem:[%s723_s1 + $0x60] sm:$0xff] }
   0xe   : > { %s474_s7 = sshll.u32 %s727_s13, 4  ;;  %519 = vmatprep.subr.bf16.mxu0 %v518_v14  ;;  %v532_v38 = vpack.c.bf16 %v193_v35, %v192_v34  ;;  %v534_v39 = vpack.c.bf16 %v211_v37, %v210_v36  ;;  %v195_v41 = vld [vmem:[%s723_s1 + $0x68] sm:$0xff]  ;;  %v212_v42 = vld [vmem:[%s723_s1 + $0xf0] sm:$0xff]  ;;  %v213_v43 = vld [vmem:[%s723_s1 + $0xf8] sm:$0xff] }
   0xf   : > { %s638_s20 = scalar_lea.vmem %s722_s0, %s474_s7  ;;  %v536_v44 = vpack.c.bf16 %v195_v41, %v194_v40  ;;  %v538_v45 = vpack.c.bf16 %v213_v43, %v212_v42  ;;  %v196_v46 = vld [vmem:[%s723_s1 + $0x70] sm:$0xff]  ;;  %v197_v47 = vld [vmem:[%s723_s1 + $0x78] sm:$0xff] }
  0x10   : > { %v181_v25 = vld [vmem:[%s638_s20 + $0x8] sm:$0xff]  ;;  %v540_v48 = vpack.c.bf16 %v197_v47, %v196_v46  ;;  %v180_v49 = vld [vmem:[%s638_s20] sm:$0xff]  ;;  %s470_s20 = sshll.u32 %s727_s13, 3 }
  0x11   : > { %278 = vmatprep.mubr.f32.mxu0 %v181_v25  ;;  %521 = vmatpush3.bf16.msra.mxu0 %v520_v19  ;;  %s175_s8 = scalar_lea.vmem %s724_s2, %s470_s20  ;;  %s179_s11 = scalar_lea.vmem %s725_s3, %s470_s20 }
  0x12   : > { %523 = vmatprep.subr.bf16.mxu0 %v522_v20 }
  0x15   : > { %525 = vmatpush3.bf16.msra.mxu0 %v524_v26 }
  0x16   : > { %527 = vmatprep.subr.bf16.mxu0 %v526_v27 }
  0x19   : > { %529 = vmatpush3.bf16.msra.mxu0 %v528_v32 }
  0x1a   : > { %531 = vmatprep.subr.bf16.mxu0 %v530_v33 }
  0x1d   : > { %533 = vmatpush3.bf16.msra.mxu0 %v532_v38 }
  0x1e   : > { %535 = vmatprep.subr.bf16.mxu0 %v534_v39 }
  0x21   : > { %537 = vmatpush3.bf16.msra.mxu0 %v536_v44 }
  0x22   : > { %539 = vmatprep.subr.bf16.mxu0 %v538_v45 }
  0x25   : > { %541 = vmatpush3.bf16.msra.mxu0 %v540_v48 }
  0x28   : > { %279 = vmatmul.mubr.f32.vlgmr.msra.gmra.mrb[0].mxu0 %v180_v49 }
  0xfb   : > { %v507_v50 = vpop.f32.mrb[0].mxu0 }
  0xfc   : > { %v508_v51 = vpop.f32.mrb[1].mxu0 }
  0xfd   : > { %v509_v52 = vadd.f32 %v508_v51, %v507_v50 }
  0xff   : > { %v285_v53 = vsel %vm284_vm0, %v509_v52, -inf }
 0x100   : > { %286 = vmax.xlane.f32.xlu0 %v285_v53 }
 0x18d   : > { %v287_v54 = vpop.xlane.xlu0 %286 }
 0x18e   : > { %v288_v55 = vsub.f32 %v509_v52, %v287_v54 }
 0x190   : > { %v289_v56 = vmul.f32 1.442695, %v288_v55 }
 0x192   : > { %550 = vpow2.f32 %v289_v56 }
 0x19c   : > { %v551_v60 = vpop.eup %550 }
 0x19d   : > { %v298_v61 = vand.u32 4294967232, %v551_v60  ;;  %v291_v17 = vsel %vm284_vm0, %v551_v60, 0.0 }
 0x19f   : > { %v299_v62 = vor.u32 %v298_v61, %v296_v59 }
 0x1a1   : > { %v301_v63 = vsel %vm284_vm0, %v299_v62, -inf }
 0x1a2   : > { %302 = vmax.xlane.f32.xlu0 %v301_v63 }
 0x22f   : > { %v303_v0 = vpop.xlane.xlu0 %302 }
 0x230   : > { %v305_v1 = vand.u32 63, %v303_v0  ;;  %v307_v33 = vand.u32 4294967232, %v303_v0 }
 0x232   : > { %vm309_vm1 = vcmp.eq.s32.totalorder %v296_v59, %v305_v1  ;;  %v306_v6 = vsub.s32 63, %v305_v1 }
 0x233   : > { %v310_v2 = vsel %vm309_vm1, -1.0, %v299_v62 }
 0x234   : > { %v311_v3 = vsel %vm284_vm0, %v310_v2, -inf }
 0x235   : > { %312 = vmax.xlane.f32.xlu1 %v311_v3 }
 0x2c2   : > { %v313_v4 = vpop.xlane.xlu1 %312 }
 0x2c3   : > { %v315_v5 = vand.u32 63, %v313_v4  ;;  %v317_v31 = vand.u32 4294967232, %v313_v4 }
 0x2c5   : > { %v316_v7 = vsub.s32 63, %v315_v5  ;;  %vm319_vm2 = vcmp.eq.s32.totalorder %v296_v59, %v315_v5  ;;  %v360_v36 = vsel %vm359_vm3, %v307_v33, %v317_v31 }
 0x2c6   : > { %v320_v8 = vsel %vm319_vm2, -1.0, %v310_v2 }
 0x2c7   : > { %v369_v9 = vsel %vm359_vm3, %v306_v6, %v316_v7  ;;  %v321_v10 = vsel %vm284_vm0, %v320_v8, -inf }
 0x2c8   : > { %322 = vmax.xlane.f32.xlu1 %v321_v10 }
 0x355   : > { %v323_v11 = vpop.xlane.xlu1 %322 }
 0x356   : > { %v325_v12 = vand.u32 63, %v323_v11  ;;  %v327_v32 = vand.u32 4294967232, %v323_v11 }
 0x358   : > { %v326_v13 = vsub.s32 63, %v325_v12  ;;  %vm329_vm4 = vcmp.eq.s32.totalorder %v296_v59, %v325_v12  ;;  %v362_v37 = vsel %vm361_vm5, %v360_v36, %v327_v32 }
 0x359   : > { %v330_v14 = vsel %vm329_vm4, -1.0, %v320_v8 }
 0x35a   : > { %v370_v15 = vsel %vm361_vm5, %v369_v9, %v326_v13  ;;  %v331_v16 = vsel %vm284_vm0, %v330_v14, -inf }
 0x35b   : > { %332 = vmax.xlane.f32.xlu0 %v331_v16 }
 0x35f   : > { %292 = vadd.xlane.f32.xlu0 %v291_v17 }
 0x3e8   : > { %v333_v18 = vpop.xlane.xlu0 %332 }
 0x3e9   : > { %v335_v19 = vand.u32 63, %v333_v18  ;;  %v337_v34 = vand.u32 4294967232, %v333_v18 }
 0x3eb   : > { %v336_v20 = vsub.s32 63, %v335_v19  ;;  %vm339_vm6 = vcmp.eq.s32.totalorder %v296_v59, %v335_v19  ;;  %v364_v39 = vsel %vm363_vm7, %v362_v37, %v337_v34 }
 0x3ec   : > { %v340_v21 = vsel %vm339_vm6, -1.0, %v330_v14  ;;  %v293_v30 = vpop.xlane.xlu0 %292 }
 0x3ed   : > { %v371_v22 = vsel %vm363_vm7, %v370_v15, %v336_v20  ;;  %v341_v23 = vsel %vm284_vm0, %v340_v21, -inf  ;;  %552 = vrcp.f32 %v293_v30 }
 0x3ee   : > { %342 = vmax.xlane.f32.xlu1 %v341_v23 }
 0x3f7   : > { %v553_v43 = vpop.eup %552 }
 0x47b   : > { %v343_v24 = vpop.xlane.xlu1 %342 }
 0x47c   : > { %v345_v25 = vand.u32 63, %v343_v24  ;;  %v347_v35 = vand.u32 4294967232, %v343_v24 }
 0x47e   : > { %v346_v26 = vsub.s32 63, %v345_v25  ;;  %vm349_vm8 = vcmp.eq.s32.totalorder %v296_v59, %v345_v25  ;;  %v366_v42 = vsel %vm365_vm9, %v364_v39, %v347_v35 }
 0x47f   : > { %v350_v27 = vsel %vm349_vm8, -1.0, %v340_v21 }
 0x480   : > { %v351_v28 = vsel %vm284_vm0, %v350_v27, -inf  ;;  %v372_v29 = vsel %vm365_vm9, %v371_v22, %v346_v26 }
 0x481   : > { %352 = vmax.xlane.f32.xlu1 %v351_v28 }
 0x50e   : > { %v353_v38 = vpop.xlane.xlu1 %352 }
 0x50f   : > { %v355_v40 = vand.u32 63, %v353_v38  ;;  %v357_v41 = vand.u32 4294967232, %v353_v38 }
 0x511   : > { %v356_v44 = vsub.s32 63, %v355_v40  ;;  %v368_v45 = vsel %vm367_vm10, %v366_v42, %v357_v41 }
 0x512   : > { %v375_v46 = vmul.f32 %v553_v43, %v368_v45 }
 0x513   : > { %v373_v47 = vsel %vm367_vm10, %v372_v29, %v356_v44 }
 0x514   : > { %377 = vst.msk [vmem:[%s175_s8] sm:$0xff] %vm376_vm11, %v375_v46  ;;  %378 = vst.msk [vmem:[%s179_s11] sm:$0xff] %vm376_vm11, %v373_v47 }
 0x515 PF: > { %s14_s12 = sadd.s32 1, %s560_s12  }
 0x516   : > { %p11_p4 = scmp.ge.s32.totalorder %s14_s12, 4  }
 0x518   :  { %13 = sbr.rel (!%p11_p4) target bundleno = 1 (0x1), region = 70 }

</bundles_post_ra>
